<compile_context>
chip_gen: v5e
topology: v5e:2x2
jax: 0.10.0
libtpu: 0.0.40
codegen_flags: <defaults>
</compile_context>

<pallas_src>
import functools

import jax
import jax.numpy as jnp
import numpy as np
from jax.experimental import pallas as pl
from jax.experimental.pallas import tpu as pltpu

IN_FEATS = 30
HID = 42
OUT = 1
FPAD = 128                       # lane-padded feature width
FUSED_MAX_NODES = 2048           # single-kernel path threshold (<= ~10 MiB VMEM)
XW_RESIDENT_BYTES = 4 * 1024 * 1024


def _round_up(x, m):
    return ((x + m - 1) // m) * m


def _device_tuning():
    """Returns (vmem_limit_bytes, max_tile) for the current TPU generation."""
    try:
        kind = jax.devices()[0].device_kind.lower()
    except Exception:  # pragma: no cover
        kind = ""
    if "v5" in kind or "v6" in kind:
        return 96 * 1024 * 1024, 1024   # 128 MiB physical VMEM
    return 48 * 1024 * 1024, 512        # v7x: 64 MiB physical VMEM (and default)


# ---------------------------------------------------------------------------
# Fused small-graph kernel: whole forward, everything resident in VMEM.
# ---------------------------------------------------------------------------
def gcn_fused_kernel(adj_ref, x_ref, dinv_ref, w1_ref, b1_ref, w2_ref, b2_ref,
                     p_ref, wl_ref, bl_ref, out_ref):
    dinv = dinv_ref[...]
    # GCNConv 1: h1 = relu(D^-1/2 (A+I) D^-1/2 (x @ W1) + b1)
    xw1 = (dinv * jnp.dot(x_ref[...], w1_ref[...],
                          preferred_element_type=jnp.float32)).astype(jnp.bfloat16)
    h1 = jnp.maximum(
        dinv * jnp.dot(adj_ref[...], xw1, preferred_element_type=jnp.float32)
        + b1_ref[...], 0.0)
    # F.dropout(x, training=self.training): identity in eval mode.
    # GCNConv 2
    xw2 = (dinv * jnp.dot(h1.astype(jnp.bfloat16), w2_ref[...],
                          preferred_element_type=jnp.float32)).astype(jnp.bfloat16)
    h2 = jnp.maximum(
        dinv * jnp.dot(adj_ref[...], xw2, preferred_element_type=jnp.float32)
        + b2_ref[...], 0.0)
    # global_mean_pool (as P @ h2) + Linear(42 -> 1)
    pooled = jnp.dot(p_ref[...], h2, preferred_element_type=jnp.float32)
    out_ref[...] = (jnp.dot(pooled, wl_ref[...],
                            preferred_element_type=jnp.float32) + bl_ref[...])


# ---------------------------------------------------------------------------
# Tiled path, kernel 1: per-node transform  xw = (dinv * (x @ W)).astype(bf16)
# (folds the "source side" D^-1/2 of A_hat into XW)
# ---------------------------------------------------------------------------
def gcn_transform_kernel(x_ref, w_ref, dinv_ref, xw_ref):
    xw = jnp.dot(x_ref[...], w_ref[...], preferred_element_type=jnp.float32)
    xw_ref[...] = (dinv_ref[...] * xw).astype(xw_ref.dtype)


def _transform(x_pad, w_pad, dinv, tile, vmem_limit):
    n_pad = x_pad.shape[0]
    return pl.pallas_call(
        gcn_transform_kernel,
        out_shape=jax.ShapeDtypeStruct((n_pad, FPAD), jnp.bfloat16),
        grid=(n_pad // tile,),
        in_specs=[
            pl.BlockSpec((tile, FPAD), lambda i: (i, 0)),
            pl.BlockSpec((FPAD, FPAD), lambda i: (0, 0)),
            pl.BlockSpec((tile, 1), lambda i: (i, 0)),
        ],
        out_specs=pl.BlockSpec((tile, FPAD), lambda i: (i, 0)),
        compiler_params=pltpu.CompilerParams(
            dimension_semantics=("parallel",), vmem_limit_bytes=vmem_limit),
        cost_estimate=pl.CostEstimate(
            flops=2 * n_pad * FPAD * FPAD, transcendentals=0,
            bytes_accessed=4 * n_pad * FPAD + 2 * FPAD * FPAD + 4 * n_pad),
    )(x_pad, w_pad, dinv)


# ---------------------------------------------------------------------------
# Tiled path, kernel 2: neighborhood aggregation
#   acc = adj @ xw   (row tiles "parallel", K tiles "arbitrary" reduction)
# epilogue: h = relu(dinv_row * acc + b); if fuse_next, additionally emit the
# next layer's transform  out = (dinv * (h @ W_next)).astype(bf16).
# ---------------------------------------------------------------------------
def gcn_aggregate_kernel(adj_ref, xw_ref, dinv_ref, b_ref, w_next_ref,
                         out_ref, acc_ref, *, tk, xw_resident, fuse_next):
    k = pl.program_id(1)

    @pl.when(k == 0)
    def _():
        acc_ref[...] = jnp.zeros_like(acc_ref)

    if xw_resident:
        start = pl.multiple_of(k * tk, tk)
        xw = xw_ref[pl.ds(start, tk), :]
    else:
        xw = xw_ref[...]
    acc_ref[...] += jnp.dot(adj_ref[...], xw, preferred_element_type=jnp.float32)

    @pl.when(k == pl.num_programs(1) - 1)
    def _():
        h = jnp.maximum(dinv_ref[...] * acc_ref[...] + b_ref[...], 0.0)
        if fuse_next:
            h = dinv_ref[...] * jnp.dot(h.astype(jnp.bfloat16), w_next_ref[...],
                                        preferred_element_type=jnp.float32)
        out_ref[...] = h.astype(out_ref.dtype)


def _aggregate(adj_bf16, xw_bf16, dinv, b_pad, w_next, tile, vmem_limit, *,
               fuse_next):
    n_pad = adj_bf16.shape[0]
    # Keep xw fully resident (re-used across all row tiles) while small; once
    # its footprint would threaten v7x's VMEM, stream it k-tiled instead.
    xw_resident = n_pad * FPAD * 2 <= XW_RESIDENT_BYTES
    if xw_resident:
        xw_spec = pl.BlockSpec((n_pad, FPAD), lambda i, k: (0, 0))
    else:
        xw_spec = pl.BlockSpec((tile, FPAD), lambda i, k: (k, 0))
    kern = functools.partial(gcn_aggregate_kernel, tk=tile,
                             xw_resident=xw_resident, fuse_next=fuse_next)
    return pl.pallas_call(
        kern,
        out_shape=jax.ShapeDtypeStruct((n_pad, FPAD), jnp.bfloat16),
        grid=(n_pad // tile, n_pad // tile),
        in_specs=[
            pl.BlockSpec((tile, tile), lambda i, k: (i, k)),       # adj tile
            xw_spec,                                               # xw
            pl.BlockSpec((tile, 1), lambda i, k: (i, 0)),          # dinv rows
            pl.BlockSpec((1, FPAD), lambda i, k: (0, 0)),          # bias
            pl.BlockSpec((FPAD, FPAD), lambda i, k: (0, 0)),       # W_next
        ],
        out_specs=pl.BlockSpec((tile, FPAD), lambda i, k: (i, 0)),
        scratch_shapes=[pltpu.VMEM((tile, FPAD), jnp.float32)],
        compiler_params=pltpu.CompilerParams(
            dimension_semantics=("parallel", "arbitrary"),
            vmem_limit_bytes=vmem_limit),
        cost_estimate=pl.CostEstimate(
            flops=2 * n_pad * n_pad * FPAD + 2 * n_pad * FPAD * FPAD,
            transcendentals=0,
            bytes_accessed=2 * n_pad * n_pad + 6 * n_pad * FPAD + 4 * n_pad),
    )(adj_bf16, xw_bf16, dinv, b_pad, w_next)


# ---------------------------------------------------------------------------
# Tiled path, kernel 3: global mean pool (P @ h2) fused with Linear(42, 1)
# ---------------------------------------------------------------------------
def pool_linear_kernel(p_ref, h_ref, wl_ref, bl_ref, out_ref, acc_ref):
    k = pl.program_id(0)

    @pl.when(k == 0)
    def _():
        acc_ref[...] = jnp.zeros_like(acc_ref)

    acc_ref[...] += jnp.dot(p_ref[...], h_ref[...],
                            preferred_element_type=jnp.float32)

    @pl.when(k == pl.num_programs(0) - 1)
    def _():
        out_ref[...] = (jnp.dot(acc_ref[...], wl_ref[...],
                                preferred_element_type=jnp.float32)
                        + bl_ref[...])


def _pool_linear(p_bf16, h_bf16, wl_pad, bl_pad, tile, vmem_limit):
    g_pad, n_pad = p_bf16.shape
    return pl.pallas_call(
        pool_linear_kernel,
        out_shape=jax.ShapeDtypeStruct((g_pad, FPAD), jnp.float32),
        grid=(n_pad // tile,),
        in_specs=[
            pl.BlockSpec((g_pad, tile), lambda k: (0, k)),
            pl.BlockSpec((tile, FPAD), lambda k: (k, 0)),
            pl.BlockSpec((FPAD, FPAD), lambda k: (0, 0)),
            pl.BlockSpec((1, FPAD), lambda k: (0, 0)),
        ],
        out_specs=pl.BlockSpec((g_pad, FPAD), lambda k: (0, 0)),
        scratch_shapes=[pltpu.VMEM((g_pad, FPAD), jnp.float32)],
        compiler_params=pltpu.CompilerParams(
            dimension_semantics=("arbitrary",), vmem_limit_bytes=vmem_limit),
        cost_estimate=pl.CostEstimate(
            flops=2 * g_pad * n_pad * FPAD + 2 * g_pad * FPAD * FPAD,
            transcendentals=0,
            bytes_accessed=2 * (g_pad * n_pad + n_pad * FPAD) + 4 * g_pad * FPAD),
    )(p_bf16, h_bf16, wl_pad, bl_pad)


# ---------------------------------------------------------------------------
# Forward pass
# ---------------------------------------------------------------------------
def gcn_forward(x, edge_index, batch, num_graphs, params, *, force_tiled=False):
    """x: [N, 30] f32, edge_index: [2, E] i32 (row0=src, row1=dst), batch: [N] i32.
    num_graphs must be a static Python int (defines the output shape)."""
    n = x.shape[0]
    vmem_limit, big_tile = _device_tuning()
    use_fused = (not force_tiled) and n <= FUSED_MAX_NODES

    if use_fused:
        n_pad = _round_up(n, 128)
        tile = n_pad
    else:
        tile = big_tile if n > big_tile else min(512, _round_up(n, 128))
        n_pad = _round_up(n, tile)
    g_pad = max(8, _round_up(num_graphs, 8))

    src, dst = edge_index[0], edge_index[1]
    node_ids = jnp.arange(n, dtype=jnp.int32)

    # Un-normalized A + I built directly in bf16 (small integer edge
    # multiplicities are exact in bf16).  The D^-1/2 (A+I) D^-1/2 scaling is
    # folded into the kernels via `dinv`; it is never materialized as N^2.
    adj = jnp.zeros((n_pad, n_pad), jnp.bfloat16)
    adj = adj.at[dst, src].add(jnp.ones(src.shape, jnp.bfloat16))
    adj = adj.at[node_ids, node_ids].add(jnp.ones((n,), jnp.bfloat16))

    # Degrees from the edge list (O(E)), not by reducing the dense matrix.
    deg = jnp.zeros((n_pad,), jnp.float32).at[dst].add(1.0)
    deg = deg.at[node_ids].add(1.0)
    dinv = jnp.where(deg > 0, jax.lax.rsqrt(jnp.maximum(deg, 1e-12)), 0.0)
    dinv = dinv.reshape(n_pad, 1).astype(jnp.float32)

    # Mean-pool matrix P[g, i] = 1/|V_g| if batch[i] == g else 0 (cols padded).
    onehot = (batch[None, :] == jnp.arange(g_pad, dtype=batch.dtype)[:, None])
    onehot = onehot.astype(jnp.float32)
    counts = onehot.sum(axis=1, keepdims=True)
    p = onehot / jnp.maximum(counts, 1.0)
    p = jnp.pad(p, ((0, 0), (0, n_pad - n)))

    w1, b1, w2, b2, wl, bl = params
    # Zero-pad every feature/lane dim to 128; matmul operands go to bf16.
    w1p = jnp.zeros((FPAD, FPAD), jnp.float32).at[:IN_FEATS, :HID].set(w1).astype(jnp.bfloat16)
    w2p = jnp.zeros((FPAD, FPAD), jnp.float32).at[:HID, :HID].set(w2).astype(jnp.bfloat16)
    b1p = jnp.zeros((1, FPAD), jnp.float32).at[0, :HID].set(b1)
    b2p = jnp.zeros((1, FPAD), jnp.float32).at[0, :HID].set(b2)
    wlp = jnp.zeros((FPAD, FPAD), jnp.float32).at[:HID, :OUT].set(wl)
    blp = jnp.zeros((1, FPAD), jnp.float32).at[0, :OUT].set(bl)
    x_pad = jnp.zeros((n_pad, FPAD), jnp.float32).at[:n, :IN_FEATS].set(x).astype(jnp.bfloat16)

    if use_fused:
        # Single gridless pallas_call: everything resident in VMEM.
        out = pl.pallas_call(
            gcn_fused_kernel,
            out_shape=jax.ShapeDtypeStruct((g_pad, FPAD), jnp.float32),
            compiler_params=pltpu.CompilerParams(vmem_limit_bytes=vmem_limit),
            cost_estimate=pl.CostEstimate(
                flops=4 * n_pad * n_pad * FPAD + 6 * n_pad * FPAD * FPAD,
                transcendentals=0,
                bytes_accessed=2 * n_pad * n_pad + 4 * n_pad * FPAD),
        )(adj, x_pad, dinv, w1p, b1p, w2p, b2p, p, wlp, blp)
        return out[:num_graphs, :OUT]

    # --- GCNConv 1: transform ---
    xw1 = _transform(x_pad, w1p, dinv, tile, vmem_limit)
    # --- GCNConv 1: aggregate + ReLU, with GCNConv 2's transform fused into
    #     the epilogue (F.dropout between layers is identity in eval mode). ---
    # TODO(synk): training-mode dropout (pltpu.prng_* masking) intentionally omitted.
    xw2 = _aggregate(adj, xw1, dinv, b1p, w2p, tile, vmem_limit, fuse_next=True)
    # --- GCNConv 2: aggregate + ReLU ---
    h2 = _aggregate(adj, xw2, dinv, b2p, w2p, tile, vmem_limit, fuse_next=False)
    # --- global_mean_pool + Linear(42 -> 1) ---
    out = _pool_linear(p.astype(jnp.bfloat16), h2, wlp, blp, tile, vmem_limit)
    return out[:num_graphs, :OUT]


# ---------------------------------------------------------------------------
# Pure-JAX reference (eval-mode GCN) for correctness checking.
# ---------------------------------------------------------------------------
def gcn_reference(x, edge_index, batch, num_graphs, params):
    n = x.shape[0]
    src, dst = edge_index[0], edge_index[1]
    adj = jnp.zeros((n, n), jnp.float32).at[dst, src].add(1.0) + jnp.eye(n)
    deg = adj.sum(axis=1)
    dinv = jax.lax.rsqrt(deg)
    a_hat = dinv[:, None] * adj * dinv[None, :]
    w1, b1, w2, b2, wl, bl = params
    h1 = jnp.maximum(a_hat @ (x @ w1) + b1, 0.0)
    h2 = jnp.maximum(a_hat @ (h1 @ w2) + b2, 0.0)
    onehot = (batch[None, :] == jnp.arange(num_graphs)[:, None]).astype(jnp.float32)
    pooled = (onehot @ h2) / onehot.sum(axis=1, keepdims=True)
    return pooled @ wl + bl


def glorot(key, shape):
    fan_in, fan_out = shape
    lim = jnp.sqrt(6.0 / (fan_in + fan_out))
    return jax.random.uniform(key, shape, jnp.float32, -lim, lim)


if __name__ == "__main__":
    key = jax.random.PRNGKey(0)
    k_w1, k_w2, k_wl, k_x1, k_x2 = jax.random.split(key, 5)

    # Deterministic parameters (shapes from the module's __init__).
    w1 = glorot(k_w1, (IN_FEATS, HID))
    b1 = jnp.zeros((HID,), jnp.float32)
    w2 = glorot(k_w2, (HID, HID))
    b2 = jnp.zeros((HID,), jnp.float32)
    wl = glorot(k_wl, (HID, OUT))
    bl = jnp.zeros((OUT,), jnp.float32)
    params = (w1, b1, w2, b2, wl, bl)

    # --- Test 1: small batch (fused single-kernel fast path) ---
    num_nodes, num_graphs = 8, 2
    x = jax.random.normal(k_x1, (num_nodes, IN_FEATS), jnp.float32)
    edge_index = jnp.array(
        [[0, 1, 1, 2, 2, 3, 4, 5, 5, 6, 6, 7],
         [1, 0, 2, 1, 3, 2, 5, 4, 6, 5, 7, 6]], dtype=jnp.int32)
    batch = jnp.array([0, 0, 0, 0, 1, 1, 1, 1], dtype=jnp.int32)

    out = jax.block_until_ready(
        gcn_forward(x, edge_index, batch, num_graphs, params))
    assert out.shape == (num_graphs, OUT)
    ref = jax.block_until_ready(
        gcn_reference(x, edge_index, batch, num_graphs, params))
    np.testing.assert_allclose(np.asarray(out), np.asarray(ref),
                               rtol=5e-2, atol=5e-2)

    # --- Test 2: larger ring graph, exercises the tiled multi-kernel path ---
    n2, g2 = 520, 4
    x2 = jax.random.normal(k_x2, (n2, IN_FEATS), jnp.float32)
    ring = jnp.arange(n2, dtype=jnp.int32)
    nxt = (ring + 1) % n2
    edge_index2 = jnp.stack([jnp.concatenate([ring, nxt]),
                             jnp.concatenate([nxt, ring])])
    batch2 = jnp.minimum(jnp.arange(n2, dtype=jnp.int32) // ((n2 + g2 - 1) // g2),
                         g2 - 1)
    out2 = jax.block_until_ready(
        gcn_forward(x2, edge_index2, batch2, g2, params, force_tiled=True))
    ref2 = jax.block_until_ready(
        gcn_reference(x2, edge_index2, batch2, g2, params))
    np.testing.assert_allclose(np.asarray(out2), np.asarray(ref2),
                               rtol=5e-2, atol=5e-2)

    print("KERNEL_OK")
</pallas_src>

<mosaic_0001>
module attributes {stable_mosaic.version = 11 : i64} {
  func.func @gcn_fused_kernel(%arg0: memref<128x128xbf16, #tpu.memory_space<vmem>>, %arg1: memref<128x128xbf16, #tpu.memory_space<vmem>>, %arg2: memref<128x1xf32, #tpu.memory_space<vmem>>, %arg3: memref<128x128xbf16, #tpu.memory_space<vmem>>, %arg4: memref<1x128xf32, #tpu.memory_space<vmem>>, %arg5: memref<128x128xbf16, #tpu.memory_space<vmem>>, %arg6: memref<1x128xf32, #tpu.memory_space<vmem>>, %arg7: memref<8x128xf32, #tpu.memory_space<vmem>>, %arg8: memref<128x128xf32, #tpu.memory_space<vmem>>, %arg9: memref<1x128xf32, #tpu.memory_space<vmem>>, %arg10: memref<8x128xf32, #tpu.memory_space<vmem>>) attributes {dimension_semantics = [], scalar_prefetch = 0 : i64, scratch_operands = 0 : i64, tpu.core_type = #tpu.core_type<tc>} {
    %c0 = arith.constant 0 : index
    %c0_0 = arith.constant 0 : index
    %0 = vector.load %arg2[%c0, %c0_0] : memref<128x1xf32, #tpu.memory_space<vmem>>, vector<128x1xf32>
    %c0_1 = arith.constant 0 : index
    %c0_2 = arith.constant 0 : index
    %1 = vector.load %arg1[%c0_1, %c0_2] : memref<128x128xbf16, #tpu.memory_space<vmem>>, vector<128x128xbf16>
    %c0_3 = arith.constant 0 : index
    %c0_4 = arith.constant 0 : index
    %2 = vector.load %arg3[%c0_3, %c0_4] : memref<128x128xbf16, #tpu.memory_space<vmem>>, vector<128x128xbf16>
    %cst = arith.constant dense<0.000000e+00> : vector<128x128xf32>
    %3 = tpu.matmul %1, %2, %cst {dimension_numbers = #tpu.dot_dimension_numbers<[1], [0], [0], [1], [0, 0, 1, 1], [], []>} : vector<128x128xbf16>, vector<128x128xbf16>, vector<128x128xf32> -> vector<128x128xf32>
    %4 = vector.broadcast %0 : vector<128x1xf32> to vector<128x128xf32>
    %5 = arith.mulf %4, %3 : vector<128x128xf32>
    %6 = arith.truncf %5 : vector<128x128xf32> to vector<128x128xbf16>
    %c0_5 = arith.constant 0 : index
    %c0_6 = arith.constant 0 : index
    %7 = vector.load %arg0[%c0_5, %c0_6] : memref<128x128xbf16, #tpu.memory_space<vmem>>, vector<128x128xbf16>
    %cst_7 = arith.constant dense<0.000000e+00> : vector<128x128xf32>
    %8 = tpu.matmul %7, %6, %cst_7 {dimension_numbers = #tpu.dot_dimension_numbers<[1], [0], [0], [1], [0, 0, 1, 1], [], []>} : vector<128x128xbf16>, vector<128x128xbf16>, vector<128x128xf32> -> vector<128x128xf32>
    %9 = vector.broadcast %0 : vector<128x1xf32> to vector<128x128xf32>
    %10 = arith.mulf %9, %8 : vector<128x128xf32>
    %c0_8 = arith.constant 0 : index
    %c0_9 = arith.constant 0 : index
    %11 = vector.load %arg4[%c0_8, %c0_9] : memref<1x128xf32, #tpu.memory_space<vmem>>, vector<1x128xf32>
    %12 = vector.broadcast %11 : vector<1x128xf32> to vector<128x128xf32>
    %13 = arith.addf %10, %12 : vector<128x128xf32>
    %cst_10 = arith.constant 0.000000e+00 : f32
    %14 = vector.broadcast %cst_10 : f32 to vector<128x128xf32>
    %15 = arith.maximumf %13, %14 : vector<128x128xf32>
    %16 = arith.truncf %15 : vector<128x128xf32> to vector<128x128xbf16>
    %c0_11 = arith.constant 0 : index
    %c0_12 = arith.constant 0 : index
    %17 = vector.load %arg5[%c0_11, %c0_12] : memref<128x128xbf16, #tpu.memory_space<vmem>>, vector<128x128xbf16>
    %cst_13 = arith.constant dense<0.000000e+00> : vector<128x128xf32>
    %18 = tpu.matmul %16, %17, %cst_13 {dimension_numbers = #tpu.dot_dimension_numbers<[1], [0], [0], [1], [0, 0, 1, 1], [], []>} : vector<128x128xbf16>, vector<128x128xbf16>, vector<128x128xf32> -> vector<128x128xf32>
    %19 = vector.broadcast %0 : vector<128x1xf32> to vector<128x128xf32>
    %20 = arith.mulf %19, %18 : vector<128x128xf32>
    %21 = arith.truncf %20 : vector<128x128xf32> to vector<128x128xbf16>
    %c0_14 = arith.constant 0 : index
    %c0_15 = arith.constant 0 : index
    %22 = vector.load %arg0[%c0_14, %c0_15] : memref<128x128xbf16, #tpu.memory_space<vmem>>, vector<128x128xbf16>
    %cst_16 = arith.constant dense<0.000000e+00> : vector<128x128xf32>
    %23 = tpu.matmul %22, %21, %cst_16 {dimension_numbers = #tpu.dot_dimension_numbers<[1], [0], [0], [1], [0, 0, 1, 1], [], []>} : vector<128x128xbf16>, vector<128x128xbf16>, vector<128x128xf32> -> vector<128x128xf32>
    %24 = vector.broadcast %0 : vector<128x1xf32> to vector<128x128xf32>
    %25 = arith.mulf %24, %23 : vector<128x128xf32>
    %c0_17 = arith.constant 0 : index
    %c0_18 = arith.constant 0 : index
    %26 = vector.load %arg6[%c0_17, %c0_18] : memref<1x128xf32, #tpu.memory_space<vmem>>, vector<1x128xf32>
    %27 = vector.broadcast %26 : vector<1x128xf32> to vector<128x128xf32>
    %28 = arith.addf %25, %27 : vector<128x128xf32>
    %cst_19 = arith.constant 0.000000e+00 : f32
    %29 = vector.broadcast %cst_19 : f32 to vector<128x128xf32>
    %30 = arith.maximumf %28, %29 : vector<128x128xf32>
    %c0_20 = arith.constant 0 : index
    %c0_21 = arith.constant 0 : index
    %31 = vector.load %arg7[%c0_20, %c0_21] : memref<8x128xf32, #tpu.memory_space<vmem>>, vector<8x128xf32>
    %cst_22 = arith.constant dense<0.000000e+00> : vector<8x128xf32>
    %32 = tpu.matmul %31, %30, %cst_22 {dimension_numbers = #tpu.dot_dimension_numbers<[1], [0], [0], [1], [0, 0, 1, 1], [], []>} : vector<8x128xf32>, vector<128x128xf32>, vector<8x128xf32> -> vector<8x128xf32>
    %c0_23 = arith.constant 0 : index
    %c0_24 = arith.constant 0 : index
    %33 = vector.load %arg8[%c0_23, %c0_24] : memref<128x128xf32, #tpu.memory_space<vmem>>, vector<128x128xf32>
    %cst_25 = arith.constant dense<0.000000e+00> : vector<8x128xf32>
    %34 = tpu.matmul %32, %33, %cst_25 {dimension_numbers = #tpu.dot_dimension_numbers<[1], [0], [0], [1], [0, 0, 1, 1], [], []>} : vector<8x128xf32>, vector<128x128xf32>, vector<8x128xf32> -> vector<8x128xf32>
    %c0_26 = arith.constant 0 : index
    %c0_27 = arith.constant 0 : index
    %35 = vector.load %arg9[%c0_26, %c0_27] : memref<1x128xf32, #tpu.memory_space<vmem>>, vector<1x128xf32>
    %36 = vector.broadcast %35 : vector<1x128xf32> to vector<8x128xf32>
    %37 = arith.addf %34, %36 : vector<8x128xf32>
    %c0_28 = arith.constant 0 : index
    %c0_29 = arith.constant 0 : index
    %38 = vector.load %arg10[%c0_28, %c0_29] : memref<8x128xf32, #tpu.memory_space<vmem>>, vector<8x128xf32>
    tpu.vector_store %arg10[%c0_28, %c0_29], %37 {strides = array<i32>} : memref<8x128xf32, #tpu.memory_space<vmem>>, vector<8x128xf32>,
    return
  }
}

</mosaic_0001>

<bundles_post_ra>
// kernel: tpu_custom_call.1
= control target key start
LH: loop header
LB: loop body
LE: loop exit
PB: predicated region body
PF: predicated region fallthrough
CT: control target
= control target key end

     0   :  { %15 = vsyncpa [#allocation3], 0  ;;  %s1685_s0 = inlined_call_operand.hbm [shape: bf16[128,128], index: 0, kind: input, shape index: {}]   ;;  %s1686_s1 = inlined_call_operand.hbm [shape: bf16[128,128], index: 1, kind: input, shape index: {}]   ;;  %s1687_s2 = inlined_call_operand.vmem [shape: f32[128,1], index: 2, kind: input, shape index: {}]   ;;  %s1688_s3 = inlined_call_operand.hbm [shape: bf16[128,128], index: 3, kind: input, shape index: {}]   ;;  %s1689_s4 = inlined_call_operand.hbm [shape: f32[1,128], index: 4, kind: input, shape index: {}]   ;;  %s1690_s5 = inlined_call_operand.hbm [shape: bf16[128,128], index: 5, kind: input, shape index: {}]   ;;  %s1691_s6 = inlined_call_operand.hbm [shape: f32[1,128], index: 6, kind: input, shape index: {}]   ;;  %s1692_s7 = inlined_call_operand.vmem [shape: f32[8,128], index: 7, kind: input, shape index: {}]   ;;  %s1693_s8 = inlined_call_operand.vmem [shape: f32[128,128], index: 8, kind: input, shape index: {}]   ;;  %s1694_s9 = inlined_call_operand.hbm [shape: f32[1,128], index: 9, kind: input, shape index: {}]   ;;  %s1695_s10 = inlined_call_operand.hbm [shape: f32[8,128], index: 10, kind: output, shape index: {}]  }
   0x1   :  { %16 = vsyncpa [#allocation6], 0 }
   0x2   :  { %17 = vsyncpa [#allocation9], 0 }
   0x3   :  { %18 = vsyncpa [#allocation12], 0 }
   0x4   :  { %19 = vsyncpa [#allocation4], 0  ;;  %s37_s15 = sshll.u32 %s1686_s1, 4  ;;  %s1308_s16 = smov [#allocation5]   ;;  %s38_s15 = int_to_ptr.hbm [resolvable:$true] %s37_s15 }
   0x5   :  { %s39_s17 = sshll.u32 %s1308_s16, 4  ;;  %s66_s20 = sshll.u32 %s1689_s4, 4  ;;  %s40_s17 = int_to_ptr.vmem [resolvable:$true] %s39_s17  ;;  %s67_s20 = int_to_ptr.hbm [resolvable:$true] %s66_s20 }
   0x6   :  { %s1309_s21 = smov 64   ;;  %s1310_s22 = smov 4  }
   0x7   :  { %45 = dma.hbm_to_vmem [thread:$0]  %s38_s15, 1024, %s40_s17, [#allocation6], %s1309_s21, %s1309_s21, %s1310_s22  }
   0x8   :  { %s1311_s23 = smov [#allocation8]   ;;  %s90_s1 = sshll.u32 %s1691_s6, 4  ;;  %s91_s1 = int_to_ptr.hbm [resolvable:$true] %s90_s1 }
   0x9   :  { %s68_s24 = sshll.u32 %s1311_s23, 4  ;;  %s24_s4 = sshll.u32 %s1685_s0, 4  ;;  %s69_s24 = int_to_ptr.vmem [resolvable:$true] %s68_s24  ;;  %s25_s4 = int_to_ptr.hbm [resolvable:$true] %s24_s4 }
   0xa   :  { %71 = dma.hbm_to_vmem [thread:$0]  %s67_s20, 16, %s69_s24, [#allocation9]  }
   0xb   :  { %s1312_s29 = smov [#allocation11]   ;;  %s1313_s11 = smov [#allocation2]  }
   0xc   :  { %s92_s30 = sshll.u32 %s1312_s29, 4  ;;  %s26_s12 = sshll.u32 %s1313_s11, 4  ;;  %s93_s30 = int_to_ptr.vmem [resolvable:$true] %s92_s30  ;;  %s27_s12 = int_to_ptr.vmem [resolvable:$true] %s26_s12 }
   0xd   :  { %95 = dma.hbm_to_vmem [thread:$0]  %s91_s1, 16, %s93_s30, [#allocation12]  }
   0xe   :  { %s52_s15 = sshll.u32 %s1688_s3, 4  ;;  %s76_s0 = sshll.u32 %s1690_s5, 4  ;;  %s53_s15 = int_to_ptr.hbm [resolvable:$true] %s52_s15  ;;  %s77_s0 = int_to_ptr.hbm [resolvable:$true] %s76_s0 }
   0xf   :  { %32 = dma.hbm_to_vmem [thread:$0]  %s25_s4, 1024, %s27_s12, [#allocation3], %s1309_s21, %s1309_s21, %s1310_s22  }
  0x10   :  { %s1314_s17 = smov [#allocation7]   ;;  %s1315_s19 = smov [#allocation10]  }
  0x11   :  { %s54_s18 = sshll.u32 %s1314_s17, 4  ;;  %s78_s3 = sshll.u32 %s1315_s19, 4  ;;  %s55_s18 = int_to_ptr.vmem [resolvable:$true] %s54_s18  ;;  %s79_s3 = int_to_ptr.vmem [resolvable:$true] %s78_s3 }
  0x12   :  { %60 = dma.hbm_to_vmem [thread:$0]  %s53_s15, 1024, %s55_s18, [#allocation6], %s1309_s21, %s1309_s21, %s1310_s22  }
  0x13   :  { %s105_s24 = sshll.u32 %s1694_s9, 4  ;;  %s1316_s5 = smov [#allocation13]   ;;  %s106_s24 = int_to_ptr.hbm [resolvable:$true] %s105_s24 }
  0x14   :  { %84 = dma.hbm_to_vmem [thread:$0]  %s77_s0, 1024, %s79_s3, [#allocation9], %s1309_s21, %s1309_s21, %s1310_s22  }
  0x15   :  { %s107_s25 = sshll.u32 %s1316_s5, 4  ;;  %s108_s25 = int_to_ptr.vmem [resolvable:$true] %s107_s25 }
  0x16   :  { %110 = dma.hbm_to_vmem [thread:$0]  %s106_s24, 16, %s108_s25, [#allocation12]  }
  0x17   :  { %1298 = dma.done.wait [#allocation3], 1024  }
  0x18   :  { %1299 = vsyncadd [#allocation3], 4294966272 }
  0x19   :  { %1300 = dma.done.wait [#allocation6], 2048  }
  0x1a   :  { %1301 = vsyncadd [#allocation6], 4294965248 }
  0x1b   :  { %1302 = dma.done.wait [#allocation9], 1040  }
  0x1c   :  { %1303 = vsyncadd [#allocation9], 4294966256 }
  0x1d   :  { %1304 = dma.done.wait [#allocation12], 32  }
  0x1e   :  { %1305 = vsyncadd [#allocation12], 4294967264  ;;  %v1317_v0 = vmov 0   ;;  %v1072_v1 = vld [vmem:[#allocation7 + $0x38] sm:$0xff]  ;;  %v153_v2 = vld [vmem:[%s1687_s2 + $0x70] sm:$0xff]  ;;  %s1318_s11 = smov [#allocation14]  }
  0x1f   :  { %1100 = vset.pattern.permute.xlu0 %v1317_v0  ;;  %1102 = vset.pattern.permute.xlu2 %v1317_v0  ;;  %v1071_v3 = vld [vmem:[#allocation7 + $0x30] sm:$0xff]  ;;  %v151_v4 = vld [vmem:[%s1687_s2 + $0x60] sm:$0xff]  ;;  %v1070_v6 = vld [vmem:[#allocation7 + $0x28] sm:$0xff]  ;;  %s914_s12 = sshll.u32 %s1318_s11, 4  ;;  %s916_s15 = sshll.u32 %s1695_s10, 4  ;;  %s915_s12 = int_to_ptr.vmem [resolvable:$true] %s914_s12  ;;  %s917_s15 = int_to_ptr.hbm [resolvable:$true] %s916_s15 }
  0x20   :  { %1101 = vset.pattern.permute.xlu1 %v1317_v0  ;;  %283 = vmatpush.bf16.msra.mxu0 %v1072_v1  ;;  %v149_v5 = vld [vmem:[%s1687_s2 + $0x50] sm:$0xff]  ;;  %v154_v7 = vld [vmem:[%s1687_s2 + $0x78] sm:$0xff]  ;;  %v1069_v8 = vld [vmem:[#allocation7 + $0x20] sm:$0xff] }
  0x21   :  { %404 = vperm.xlu0 %1100, %v153_v2   ;;  %394 = vperm.xlu1 %1101, %v151_v4   ;;  %v152_v9 = vld [vmem:[%s1687_s2 + $0x68] sm:$0xff]  ;;  %v150_v10 = vld [vmem:[%s1687_s2 + $0x58] sm:$0xff]  ;;  %v147_v12 = vld [vmem:[%s1687_s2 + $0x40] sm:$0xff] }
  0x22   :  { %384 = vperm.xlu2 %1102, %v149_v5   ;;  %v1068_v11 = vld [vmem:[#allocation7 + $0x18] sm:$0xff]  ;;  %v1067_v13 = vld [vmem:[#allocation7 + $0x10] sm:$0xff]  ;;  %v148_v14 = vld [vmem:[%s1687_s2 + $0x48] sm:$0xff] }
  0x23   :  { %v145_v15 = vld [vmem:[%s1687_s2 + $0x30] sm:$0xff]  ;;  %v1066_v16 = vld [vmem:[#allocation7 + $0x8] sm:$0xff]  ;;  %v146_v17 = vld [vmem:[%s1687_s2 + $0x38] sm:$0xff] }
  0x24   :  { %284 = vmatpush.bf16.msra.mxu0 %v1071_v3  ;;  %v1065_v18 = vld [vmem:[#allocation7] sm:$0xff]  ;;  %v144_v19 = vld [vmem:[%s1687_s2 + $0x28] sm:$0xff]  ;;  %v141_v22 = vld [vmem:[%s1687_s2 + $0x10] sm:$0xff] }
  0x25   :  { %v143_v20 = vld [vmem:[%s1687_s2 + $0x20] sm:$0xff]  ;;  %v142_v23 = vld [vmem:[%s1687_s2 + $0x18] sm:$0xff]  ;;  %v140_v25 = vld [vmem:[%s1687_s2 + $0x8] sm:$0xff] }
  0x26   :  { %v1057_v21 = vld [vmem:[#allocation5] sm:$0xff]  ;;  %v1058_v26 = vld [vmem:[#allocation5 + $0x8] sm:$0xff]  ;;  %v1059_v27 = vld [vmem:[#allocation5 + $0x10] sm:$0xff] }
  0x27   :  { %v139_v24 = vld [vmem:[%s1687_s2] sm:$0xff]  ;;  %v1060_v28 = vld [vmem:[#allocation5 + $0x18] sm:$0xff]  ;;  %v1062_v30 = vld [vmem:[#allocation5 + $0x28] sm:$0xff] }
  0x28   :  { %285 = vmatpush.bf16.msra.mxu0 %v1070_v6  ;;  %v1061_v29 = vld [vmem:[#allocation5 + $0x20] sm:$0xff]  ;;  %v1063_v34 = vld [vmem:[#allocation5 + $0x30] sm:$0xff]  ;;  %v1064_v38 = vld [vmem:[#allocation5 + $0x38] sm:$0xff] }
  0x29   :  { %409 = vperm.xlu0 %1100, %v154_v7   ;;  %399 = vperm.xlu1 %1101, %v152_v9  }
  0x2a   :  { %389 = vperm.xlu2 %1102, %v150_v10  }
  0x2c   :  { %286 = vmatpush.bf16.msra.mxu0 %v1069_v8 }
  0x30   :  { %287 = vmatpush.bf16.msra.mxu0 %v1068_v11 }
  0x31   :  { %374 = vperm.xlu0 %1100, %v147_v12   ;;  %379 = vperm.xlu1 %1101, %v148_v14  }
  0x32   :  { %364 = vperm.xlu2 %1102, %v145_v15  }
  0x34   :  { %288 = vmatpush.bf16.msra.mxu0 %v1067_v13 }
  0x38   :  { %289 = vmatpush.bf16.msra.mxu0 %v1066_v16 }
  0x39   :  { %369 = vperm.xlu0 %1100, %v146_v17   ;;  %354 = vperm.xlu1 %1101, %v143_v20  }
  0x3a   :  { %359 = vperm.xlu2 %1102, %v144_v19  }
  0x3c   :  { %290 = vmatpush.bf16.msra.mxu0 %v1065_v18 }
  0x3f   :  { %291 = vmatmul.bf16.vlgmr.msra.gmra.mxu0 %v1057_v21 }
  0x41   :  { %344 = vperm.xlu0 %1100, %v141_v22   ;;  %349 = vperm.xlu1 %1101, %v142_v23  }
  0x42   :  { %334 = vperm.xlu2 %1102, %v139_v24  }
  0x49   :  { %339 = vperm.xlu0 %1100, %v140_v25   ;;  %v1503_v25 = vld [vmem:[#allocation2] sm:$0xff] }
  0x4f   :  { %296 = vmatmul.bf16.gmra.mxu0 %v1058_v26  ;;  %v1506_v26 = vld [vmem:[#allocation2 + $0x8] sm:$0xff] }
  0x5f   :  { %301 = vmatmul.bf16.gmra.mxu0 %v1059_v27  ;;  %v1509_v27 = vld [vmem:[#allocation2 + $0x10] sm:$0xff] }
  0x6f   :  { %306 = vmatmul.bf16.gmra.mxu0 %v1060_v28  ;;  %v1512_v28 = vld [vmem:[#allocation2 + $0x18] sm:$0xff] }
  0x7c   :  { %v1457_v32 = vpop.permute.xlu2 %384 }
  0x7f   :  { %311 = vmatmul.bf16.gmra.mxu0 %v1061_v29  ;;  %v1515_v29 = vld [vmem:[#allocation2 + $0x20] sm:$0xff] }
  0x84   :  { %v1461_v35 = vpop.permute.xlu2 %389 }
  0x8c   :  { %v1467_v39 = vpop.permute.xlu2 %364 }
  0x8f   :  { %316 = vmatmul.bf16.gmra.mxu0 %v1062_v30  ;;  %v1088_v30 = vld [vmem:[#allocation10 + $0x38] sm:$0xff] }
  0x90   :  { %673 = vmatpush.bf16.msra.mxu2 %v1088_v30 }
  0x93   :  { %v1455_v31 = vpop.permute.xlu0 %404  ;;  %v1465_v37 = vpop.permute.xlu1 %394 }
  0x94   :  { %v1473_v42 = vpop.permute.xlu2 %359 }
  0x9b   :  { %v1459_v33 = vpop.permute.xlu0 %409  ;;  %v1471_v41 = vpop.permute.xlu1 %399 }
  0x9c   :  { %v1479_v46 = vpop.permute.xlu2 %334 }
  0x9f   :  { %321 = vmatmul.bf16.gmra.mxu0 %v1063_v34  ;;  %v1518_v34 = vld [vmem:[#allocation2 + $0x28] sm:$0xff] }
  0xa3   :  { %v1463_v36 = vpop.permute.xlu0 %374  ;;  %v1477_v45 = vpop.permute.xlu1 %379 }
  0xab   :  { %v1469_v40 = vpop.permute.xlu0 %369  ;;  %v1485_v52 = vpop.permute.xlu1 %354 }
  0xaf   :  { %326 = vmatmul.bf16.gmra.mxu0 %v1064_v38  ;;  %v1087_v38 = vld [vmem:[#allocation10 + $0x30] sm:$0xff] }
  0xb0   :  { %674 = vmatpush.bf16.msra.mxu2 %v1087_v38 }
  0xb3   :  { %v1475_v43 = vpop.permute.xlu0 %344  ;;  %v1487_v54 = vpop.permute.xlu1 %349 }
  0xbb   :  { %v1481_v47 = vpop.permute.xlu0 %339 }
  0xbc   :  { %v292_v44 = vpop.f32.mrf.mxu0 }
  0xbd   :  { %v412_v49 = vmul.f32 %v1479_v46, %v292_v44  ;;  %v1086_v44 = vld [vmem:[#allocation10 + $0x28] sm:$0xff] }
  0xbe   :  { %675 = vmatpush.bf16.msra.mxu2 %v1086_v44 }
  0xc4   :  { %v294_v48 = vpop.f32.mrf.mxu0 }
  0xc5   :  { %v413_v50 = vmul.f32 %v1481_v47, %v294_v48  ;;  %v1085_v48 = vld [vmem:[#allocation10 + $0x20] sm:$0xff] }
  0xc6   :  { %676 = vmatpush.bf16.msra.mxu2 %v1085_v48 }
  0xc7   :  { %v428_v51 = vpack.c.bf16 %v413_v50, %v412_v49  ;;  %v1521_v49 = vld [vmem:[#allocation2 + $0x30] sm:$0xff]  ;;  %v1084_v50 = vld [vmem:[#allocation10 + $0x18] sm:$0xff] }
  0xca   :  { %677 = vmatpush.bf16.msra.mxu2 %v1084_v50 }
  0xcc   :  { %v297_v53 = vpop.f32.mrf.mxu0 }
  0xcd   :  { %v414_v56 = vmul.f32 %v1475_v43, %v297_v53  ;;  %v1082_v53 = vld [vmem:[#allocation10 + $0x8] sm:$0xff] }
  0xd4   :  { %v299_v55 = vpop.f32.mrf.mxu0 }
  0xd5   :  { %v415_v57 = vmul.f32 %v1487_v54, %v299_v55  ;;  %v1081_v55 = vld [vmem:[#allocation10] sm:$0xff] }
  0xd7   :  { %v429_v58 = vpack.c.bf16 %v415_v57, %v414_v56  ;;  %v1524_v56 = vld [vmem:[#allocation2 + $0x38] sm:$0xff] }
  0xdc   :  { %v302_v59 = vpop.f32.mrf.mxu0 }
  0xdd   :  { %v416_v61 = vmul.f32 %v1485_v52, %v302_v59  ;;  %v1528_v59 = vld [vmem:[#allocation8] ss:$0 sm:$0xff] }
  0xe4   :  { %v304_v60 = vpop.f32.mrf.mxu0 }
  0xe5   :  { %v417_v62 = vmul.f32 %v1473_v42, %v304_v60 }
  0xe7   :  { %v430_v63 = vpack.c.bf16 %v417_v62, %v416_v61 }
  0xec   :  { %v307_v0 = vpop.f32.mrf.mxu0 }
  0xed   :  { %v418_v2 = vmul.f32 %v1467_v39, %v307_v0 }
  0xf4   :  { %v309_v1 = vpop.f32.mrf.mxu0 }
  0xf5   :  { %v419_v3 = vmul.f32 %v1469_v40, %v309_v1 }
  0xf7   :  { %v431_v4 = vpack.c.bf16 %v419_v3, %v418_v2 }
  0xfc   :  { %v312_v5 = vpop.f32.mrf.mxu0 }
  0xfd   :  { %v420_v23 = vmul.f32 %v1463_v36, %v312_v5 }
 0x104   :  { %v314_v6 = vpop.f32.mrf.mxu0 }
 0x105   :  { %v421_v21 = vmul.f32 %v1477_v45, %v314_v6 }
 0x107   :  { %v432_v24 = vpack.c.bf16 %v421_v21, %v420_v23 }
 0x10c   :  { %v317_v7 = vpop.f32.mrf.mxu0 }
 0x10d   :  { %v422_v20 = vmul.f32 %v1457_v32, %v317_v7 }
 0x114   :  { %v319_v8 = vpop.f32.mrf.mxu0 }
 0x115   :  { %v423_v18 = vmul.f32 %v1461_v35, %v319_v8 }
 0x117   :  { %v433_v22 = vpack.c.bf16 %v423_v18, %v422_v20 }
 0x11c   :  { %v322_v9 = vpop.f32.mrf.mxu0 }
 0x11d   :  { %v424_v17 = vmul.f32 %v1465_v37, %v322_v9 }
 0x124   :  { %v324_v10 = vpop.f32.mrf.mxu0 }
 0x125   :  { %v425_v15 = vmul.f32 %v1471_v41, %v324_v10 }
 0x127   :  { %v434_v19 = vpack.c.bf16 %v425_v15, %v424_v17 }
 0x12c   :  { %v327_v11 = vpop.f32.mrf.mxu0 }
 0x12d   :  { %v426_v13 = vmul.f32 %v1455_v31, %v327_v11 }
 0x134   :  { %v329_v12 = vpop.f32.mrf.mxu0 }
 0x135   :  { %v427_v14 = vmul.f32 %v1459_v33, %v329_v12 }
 0x137   :  { %v435_v16 = vpack.c.bf16 %v427_v14, %v426_v13 }
 0x139   :  { %500 = vmatpush.bf16.msra.mxu1 %v435_v16 }
 0x13d   :  { %501 = vmatpush.bf16.msra.mxu1 %v434_v19 }
 0x141   :  { %502 = vmatpush.bf16.msra.mxu1 %v433_v22 }
 0x145   :  { %503 = vmatpush.bf16.msra.mxu1 %v432_v24 }
 0x149   :  { %504 = vmatpush.bf16.msra.mxu1 %v431_v4 }
 0x14d   :  { %505 = vmatpush.bf16.msra.mxu1 %v430_v63 }
 0x151   :  { %506 = vmatpush.bf16.msra.mxu1 %v429_v58 }
 0x155   :  { %507 = vmatpush.bf16.msra.mxu1 %v428_v51  ;;  %v1083_v51 = vld [vmem:[#allocation10 + $0x10] sm:$0xff] }
 0x156   :  { %678 = vmatpush.bf16.msra.mxu2 %v1083_v51 }
 0x158   :  { %508 = vmatmul.bf16.vlgmr.msra.gmra.mxu1 %v1503_v25 }
 0x15a   :  { %679 = vmatpush.bf16.msra.mxu2 %v1082_v53 }
 0x15e   :  { %680 = vmatpush.bf16.msra.mxu2 %v1081_v55 }
 0x168   :  { %513 = vmatmul.bf16.gmra.mxu1 %v1506_v26 }
 0x178   :  { %518 = vmatmul.bf16.gmra.mxu1 %v1509_v27 }
 0x188   :  { %523 = vmatmul.bf16.gmra.mxu1 %v1512_v28 }
 0x198   :  { %528 = vmatmul.bf16.gmra.mxu1 %v1515_v29 }
 0x1a8   :  { %533 = vmatmul.bf16.gmra.mxu1 %v1518_v34 }
 0x1b8   :  { %538 = vmatmul.bf16.gmra.mxu1 %v1521_v49 }
 0x1c8   :  { %543 = vmatmul.bf16.gmra.mxu1 %v1524_v56 }
 0x1d5   :  { %v509_v57 = vpop.f32.mrf.mxu1 }
 0x1d6   :  { %v549_v58 = vmul.f32 %v509_v57, %v1479_v46 }
 0x1d8   :  { %v569_v61 = vadd.f32 %v1528_v59, %v549_v58 }
 0x1da   :  { %v585_v0 = vmax.f32 %v569_v61, 0.0 }
 0x1dd   :  { %v511_v60 = vpop.f32.mrf.mxu1 }
 0x1de   :  { %v550_v62 = vmul.f32 %v511_v60, %v1481_v47 }
 0x1e0   :  { %v570_v63 = vadd.f32 %v1528_v59, %v550_v62 }
 0x1e2   :  { %v586_v1 = vmax.f32 %v570_v63, 0.0 }
 0x1e4   :  { %v601_v2 = vpack.c.bf16 %v586_v1, %v585_v0 }
 0x1e5   :  { %v514_v3 = vpop.f32.mrf.mxu1 }
 0x1e6   :  { %681 = vmatmul.bf16.vlgmr.msra.gmra.mxu2 %v601_v2  ;;  %v551_v4 = vmul.f32 %v514_v3, %v1475_v43 }
 0x1e8   :  { %v571_v6 = vadd.f32 %v1528_v59, %v551_v4 }
 0x1ea   :  { %v587_v9 = vmax.f32 %v571_v6, 0.0 }
 0x1ed   :  { %v516_v5 = vpop.f32.mrf.mxu1 }
 0x1ee   :  { %v552_v7 = vmul.f32 %v516_v5, %v1487_v54 }
 0x1f0   :  { %v572_v8 = vadd.f32 %v1528_v59, %v552_v7 }
 0x1f2   :  { %v588_v10 = vmax.f32 %v572_v8, 0.0 }
 0x1f4   :  { %v602_v11 = vpack.c.bf16 %v588_v10, %v587_v9 }
 0x1f5   :  { %v519_v12 = vpop.f32.mrf.mxu1 }
 0x1f6   :  { %686 = vmatmul.bf16.gmra.mxu2 %v602_v11  ;;  %v553_v13 = vmul.f32 %v519_v12, %v1485_v52 }
 0x1f8   :  { %v573_v15 = vadd.f32 %v1528_v59, %v553_v13 }
 0x1fa   :  { %v589_v18 = vmax.f32 %v573_v15, 0.0 }
 0x1fd   :  { %v521_v14 = vpop.f32.mrf.mxu1 }
 0x1fe   :  { %v554_v16 = vmul.f32 %v521_v14, %v1473_v42 }
 0x200   :  { %v574_v17 = vadd.f32 %v1528_v59, %v554_v16 }
 0x202   :  { %v590_v19 = vmax.f32 %v574_v17, 0.0 }
 0x204   :  { %v603_v20 = vpack.c.bf16 %v590_v19, %v589_v18 }
 0x205   :  { %v524_v21 = vpop.f32.mrf.mxu1 }
 0x206   :  { %691 = vmatmul.bf16.gmra.mxu2 %v603_v20  ;;  %v555_v22 = vmul.f32 %v524_v21, %v1467_v39 }
 0x208   :  { %v575_v24 = vadd.f32 %v1528_v59, %v555_v22 }
 0x20a   :  { %v591_v44 = vmax.f32 %v575_v24, 0.0 }
 0x20d   :  { %v526_v23 = vpop.f32.mrf.mxu1 }
 0x20e   :  { %v556_v30 = vmul.f32 %v526_v23, %v1469_v40 }
 0x210   :  { %v576_v38 = vadd.f32 %v1528_v59, %v556_v30 }
 0x212   :  { %v592_v48 = vmax.f32 %v576_v38, 0.0 }
 0x214   :  { %v604_v50 = vpack.c.bf16 %v592_v48, %v591_v44 }
 0x215   :  { %v529_v51 = vpop.f32.mrf.mxu1 }
 0x216   :  { %696 = vmatmul.bf16.gmra.mxu2 %v604_v50  ;;  %v557_v53 = vmul.f32 %v529_v51, %v1463_v36 }
 0x218   :  { %v577_v57 = vadd.f32 %v1528_v59, %v557_v53 }
 0x21a   :  { %v593_v61 = vmax.f32 %v577_v57, 0.0 }
 0x21d   :  { %v531_v55 = vpop.f32.mrf.mxu1 }
 0x21e   :  { %v558_v58 = vmul.f32 %v531_v55, %v1477_v45 }
 0x220   :  { %v578_v60 = vadd.f32 %v1528_v59, %v558_v58 }
 0x222   :  { %v594_v62 = vmax.f32 %v578_v60, 0.0 }
 0x224   :  { %v605_v63 = vpack.c.bf16 %v594_v62, %v593_v61 }
 0x225   :  { %v534_v0 = vpop.f32.mrf.mxu1 }
 0x226   :  { %701 = vmatmul.bf16.gmra.mxu2 %v605_v63  ;;  %v559_v1 = vmul.f32 %v534_v0, %v1457_v32 }
 0x228   :  { %v579_v3 = vadd.f32 %v1528_v59, %v559_v1 }
 0x22a   :  { %v595_v6 = vmax.f32 %v579_v3, 0.0 }
 0x22d   :  { %v536_v2 = vpop.f32.mrf.mxu1 }
 0x22e   :  { %v560_v4 = vmul.f32 %v536_v2, %v1461_v35 }
 0x230   :  { %v580_v5 = vadd.f32 %v1528_v59, %v560_v4 }
 0x232   :  { %v596_v7 = vmax.f32 %v580_v5, 0.0 }
 0x234   :  { %v606_v8 = vpack.c.bf16 %v596_v7, %v595_v6 }
 0x235   :  { %v539_v9 = vpop.f32.mrf.mxu1 }
 0x236   :  { %706 = vmatmul.bf16.gmra.mxu2 %v606_v8  ;;  %v561_v10 = vmul.f32 %v539_v9, %v1465_v37 }
 0x238   :  { %v581_v12 = vadd.f32 %v1528_v59, %v561_v10 }
 0x23a   :  { %v597_v15 = vmax.f32 %v581_v12, 0.0 }
 0x23d   :  { %v541_v11 = vpop.f32.mrf.mxu1 }
 0x23e   :  { %v562_v13 = vmul.f32 %v541_v11, %v1471_v41 }
 0x240   :  { %v582_v14 = vadd.f32 %v1528_v59, %v562_v13 }
 0x242   :  { %v598_v16 = vmax.f32 %v582_v14, 0.0 }
 0x244   :  { %v607_v17 = vpack.c.bf16 %v598_v16, %v597_v15 }
 0x245   :  { %v544_v18 = vpop.f32.mrf.mxu1 }
 0x246   :  { %711 = vmatmul.bf16.gmra.mxu2 %v607_v17  ;;  %v563_v19 = vmul.f32 %v544_v18, %v1455_v31 }
 0x248   :  { %v583_v21 = vadd.f32 %v1528_v59, %v563_v19 }
 0x24a   :  { %v599_v24 = vmax.f32 %v583_v21, 0.0 }
 0x24d   :  { %v546_v20 = vpop.f32.mrf.mxu1 }
 0x24e   :  { %v564_v22 = vmul.f32 %v546_v20, %v1459_v33 }
 0x250   :  { %v584_v23 = vadd.f32 %v1528_v59, %v564_v22 }
 0x252   :  { %v600_v30 = vmax.f32 %v584_v23, 0.0 }
 0x254   :  { %v608_v38 = vpack.c.bf16 %v600_v30, %v599_v24 }
 0x256   :  { %716 = vmatmul.bf16.gmra.mxu2 %v608_v38 }
 0x269   :  { %v682_v44 = vpop.f32.mrf.mxu2 }
 0x26a   :  { %v722_v50 = vmul.f32 %v682_v44, %v1479_v46 }
 0x271   :  { %v684_v48 = vpop.f32.mrf.mxu2 }
 0x272   :  { %v723_v51 = vmul.f32 %v684_v48, %v1481_v47 }
 0x274   :  { %v738_v53 = vpack.c.bf16 %v723_v51, %v722_v50 }
 0x279   :  { %v687_v55 = vpop.f32.mrf.mxu2 }
 0x27a   :  { %v724_v58 = vmul.f32 %v687_v55, %v1475_v43 }
 0x281   :  { %v689_v57 = vpop.f32.mrf.mxu2 }
 0x282   :  { %v725_v60 = vmul.f32 %v689_v57, %v1487_v54 }
 0x284   :  { %v739_v61 = vpack.c.bf16 %v725_v60, %v724_v58 }
 0x289   :  { %v692_v62 = vpop.f32.mrf.mxu2 }
 0x28a   :  { %v726_v63 = vmul.f32 %v692_v62, %v1485_v52 }
 0x291   :  { %v694_v59 = vpop.f32.mrf.mxu2 }
 0x292   :  { %v727_v0 = vmul.f32 %v694_v59, %v1473_v42  ;;  %v1596_v59 = vld [vmem:[#allocation11] ss:$0 sm:$0xff] }
 0x294   :  { %v740_v1 = vpack.c.bf16 %v727_v0, %v726_v63 }
 0x299   :  { %v697_v2 = vpop.f32.mrf.mxu2 }
 0x29a   :  { %v728_v4 = vmul.f32 %v697_v2, %v1467_v39 }
 0x2a1   :  { %v699_v3 = vpop.f32.mrf.mxu2 }
 0x2a2   :  { %v729_v5 = vmul.f32 %v699_v3, %v1469_v40 }
 0x2a4   :  { %v741_v6 = vpack.c.bf16 %v729_v5, %v728_v4 }
 0x2a9   :  { %v702_v7 = vpop.f32.mrf.mxu2 }
 0x2aa   :  { %v730_v30 = vmul.f32 %v702_v7, %v1463_v36 }
 0x2b1   :  { %v704_v8 = vpop.f32.mrf.mxu2 }
 0x2b2   :  { %v731_v23 = vmul.f32 %v704_v8, %v1477_v45 }
 0x2b4   :  { %v742_v38 = vpack.c.bf16 %v731_v23, %v730_v30 }
 0x2b9   :  { %v707_v9 = vpop.f32.mrf.mxu2 }
 0x2ba   :  { %v732_v22 = vmul.f32 %v707_v9, %v1457_v32  ;;  %v880_v9 = vld [vmem:[%s1693_s8 + $0x60] sm:$0xff] }
 0x2c1   :  { %v709_v10 = vpop.f32.mrf.mxu2 }
 0x2c2   :  { %v733_v20 = vmul.f32 %v709_v10, %v1461_v35 }
 0x2c4   :  { %v743_v24 = vpack.c.bf16 %v733_v20, %v732_v22 }
 0x2c9   :  { %v712_v11 = vpop.f32.mrf.mxu2 }
 0x2ca   :  { %v734_v19 = vmul.f32 %v712_v11, %v1465_v37 }
 0x2d1   :  { %v714_v12 = vpop.f32.mrf.mxu2 }
 0x2d2   :  { %v735_v17 = vmul.f32 %v714_v12, %v1471_v41  ;;  %v879_v12 = vld [vmem:[%s1693_s8 + $0x58] sm:$0xff] }
 0x2d4   :  { %v744_v21 = vpack.c.bf16 %v735_v17, %v734_v19 }
 0x2d9   :  { %v717_v13 = vpop.f32.mrf.mxu2 }
 0x2da   :  { %v736_v15 = vmul.f32 %v717_v13, %v1455_v31 }
 0x2e1   :  { %v719_v14 = vpop.f32.mrf.mxu2 }
 0x2e2   :  { %v737_v16 = vmul.f32 %v719_v14, %v1459_v33 }
 0x2e4   :  { %v745_v18 = vpack.c.bf16 %v737_v16, %v736_v15  ;;  %v878_v15 = vld [vmem:[%s1693_s8 + $0x50] sm:$0xff] }
 0x2e6   :  { %746 = vmatpush.bf16.msra.mxu3 %v745_v18  ;;  %v877_v18 = vld [vmem:[%s1693_s8 + $0x48] sm:$0xff] }
 0x2ea   :  { %747 = vmatpush.bf16.msra.mxu3 %v744_v21  ;;  %v876_v21 = vld [vmem:[%s1693_s8 + $0x40] sm:$0xff] }
 0x2ee   :  { %748 = vmatpush.bf16.msra.mxu3 %v743_v24  ;;  %v875_v24 = vld [vmem:[%s1693_s8 + $0x38] sm:$0xff] }
 0x2f2   :  { %749 = vmatpush.bf16.msra.mxu3 %v742_v38 }
 0x2f6   :  { %750 = vmatpush.bf16.msra.mxu3 %v741_v6 }
 0x2fa   :  { %751 = vmatpush.bf16.msra.mxu3 %v740_v1 }
 0x2fe   :  { %752 = vmatpush.bf16.msra.mxu3 %v739_v61 }
 0x302   :  { %753 = vmatpush.bf16.msra.mxu3 %v738_v53 }
 0x305   :  { %754 = vmatmul.bf16.vlgmr.msra.gmra.mxu3 %v1503_v25 }
 0x315   :  { %759 = vmatmul.bf16.gmra.mxu3 %v1506_v26 }
 0x325   :  { %764 = vmatmul.bf16.gmra.mxu3 %v1509_v27 }
 0x335   :  { %769 = vmatmul.bf16.gmra.mxu3 %v1512_v28 }
 0x345   :  { %774 = vmatmul.bf16.gmra.mxu3 %v1515_v29 }
 0x355   :  { %779 = vmatmul.bf16.gmra.mxu3 %v1518_v34 }
 0x365   :  { %784 = vmatmul.bf16.gmra.mxu3 %v1521_v49 }
 0x375   :  { %789 = vmatmul.bf16.gmra.mxu3 %v1524_v56 }
 0x388   :  { %v1585_v44 = vpop.f32.mrf.mxu3 }
 0x390   :  { %v1587_v48 = vpop.f32.mrf.mxu3 }
 0x398   :  { %v1589_v50 = vpop.f32.mrf.mxu3 }
 0x3a0   :  { %v1591_v25 = vpop.f32.mrf.mxu3 }
 0x3a8   :  { %v765_v26 = vpop.f32.mrf.mxu3 }
 0x3b0   :  { %v767_v27 = vpop.f32.mrf.mxu3 }
 0x3b8   :  { %v770_v51 = vpop.f32.mrf.mxu3 }
 0x3c0   :  { %v772_v28 = vpop.f32.mrf.mxu3 }
 0x3c8   :  { %v775_v53 = vpop.f32.mrf.mxu3 }
 0x3d0   :  { %v777_v29 = vpop.f32.mrf.mxu3 }
 0x3d1   :  { %v804_v6 = vmul.f32 %v777_v29, %v1477_v45  ;;  %v802_v45 = vmul.f32 %v772_v28, %v1469_v40  ;;  %v800_v40 = vmul.f32 %v767_v27, %v1473_v42  ;;  %v798_v42 = vmul.f32 %v1591_v25, %v1487_v54  ;;  %v873_v54 = vld [vmem:[%s1693_s8 + $0x28] sm:$0xff] }
 0x3d2   :  { %v796_v25 = vmul.f32 %v1587_v48, %v1481_v47  ;;  %v871_v47 = vld [vmem:[%s1693_s8 + $0x18] sm:$0xff] }
 0x3d3   :  { %v824_v14 = vadd.f32 %v1596_v59, %v804_v6  ;;  %v822_v20 = vadd.f32 %v1596_v59, %v802_v45  ;;  %v820_v38 = vadd.f32 %v1596_v59, %v800_v40 }
 0x3d5   :  { %v840_v19 = vmax.f32 %v824_v14, 0.0  ;;  %v838_v30 = vmax.f32 %v822_v20, 0.0  ;;  %v836_v28 = vmax.f32 %v820_v38, 0.0 }
 0x3d8   :  { %v780_v55 = vpop.f32.mrf.mxu3 }
 0x3e0   :  { %v782_v34 = vpop.f32.mrf.mxu3 }
 0x3e1   :  { %v806_v2 = vmul.f32 %v782_v34, %v1461_v35  ;;  %v881_v35 = vld [vmem:[%s1693_s8 + $0x68] sm:$0xff]  ;;  %v816_v34 = vadd.f32 %v1596_v59, %v796_v25 }
 0x3e3   :  { %v826_v8 = vadd.f32 %v1596_v59, %v806_v2 }
 0x3e5   :  { %v842_v13 = vmax.f32 %v826_v8, 0.0 }
 0x3e8   :  { %v785_v57 = vpop.f32.mrf.mxu3 }
 0x3e9   :  { %v807_v63 = vmul.f32 %v785_v57, %v1465_v37  ;;  %v805_v37 = vmul.f32 %v780_v55, %v1457_v32  ;;  %v803_v32 = vmul.f32 %v775_v53, %v1463_v36  ;;  %v801_v36 = vmul.f32 %v770_v51, %v1467_v39  ;;  %v870_v57 = vld [vmem:[%s1693_s8 + $0x10] sm:$0xff] }
 0x3ea   :  { %v799_v39 = vmul.f32 %v765_v26, %v1485_v52  ;;  %v874_v52 = vld [vmem:[%s1693_s8 + $0x30] sm:$0xff]  ;;  %v797_v26 = vmul.f32 %v1589_v50, %v1475_v43  ;;  %v818_v53 = vadd.f32 %v1596_v59, %v798_v42  ;;  %v872_v43 = vld [vmem:[%s1693_s8 + $0x20] sm:$0xff]  ;;  %v795_v50 = vmul.f32 %v1585_v44, %v1479_v46 }
 0x3eb   :  { %v827_v5 = vadd.f32 %v1596_v59, %v807_v63  ;;  %v825_v11 = vadd.f32 %v1596_v59, %v805_v37  ;;  %v823_v17 = vadd.f32 %v1596_v59, %v803_v32  ;;  %v821_v23 = vadd.f32 %v1596_v59, %v801_v36 }
 0x3ec   :  { %v819_v51 = vadd.f32 %v1596_v59, %v799_v39  ;;  %v817_v55 = vadd.f32 %v1596_v59, %v797_v26  ;;  %v834_v48 = vmax.f32 %v818_v53, 0.0  ;;  %v815_v44 = vadd.f32 %v1596_v59, %v795_v50 }
 0x3ed   :  { %v843_v10 = vmax.f32 %v827_v5, 0.0  ;;  %v841_v16 = vmax.f32 %v825_v11, 0.0  ;;  %v839_v22 = vmax.f32 %v823_v17, 0.0  ;;  %v837_v27 = vmax.f32 %v821_v23, 0.0 }
 0x3ee   :  { %v835_v29 = vmax.f32 %v819_v51, 0.0  ;;  %v833_v46 = vmax.f32 %v817_v55, 0.0 }
 0x3f0   :  { %v787_v49 = vpop.f32.mrf.mxu3 }
 0x3f1   :  { %v808_v61 = vmul.f32 %v787_v49, %v1471_v41  ;;  %v869_v49 = vld [vmem:[%s1693_s8 + $0x8] sm:$0xff] }
 0x3f3   :  { %v828_v4 = vadd.f32 %v1596_v59, %v808_v61  ;;  %v847_v61 = vld [vmem:[%s1692_s7] sm:$0xff] }
 0x3f5   :  { %v844_v7 = vmax.f32 %v828_v4, 0.0 }
 0x3f8   :  { %v790_v58 = vpop.f32.mrf.mxu3 }
 0x3f9   :  { %v809_v56 = vmul.f32 %v790_v58, %v1455_v31  ;;  %v883_v31 = vld [vmem:[%s1693_s8 + $0x78] sm:$0xff]  ;;  %v832_v58 = vmax.f32 %v816_v34, 0.0 }
 0x3fa   :  { %888 = vmatpush.msrb.mxu1 %v883_v31 }
 0x3fb   :  { %v829_v1 = vadd.f32 %v1596_v59, %v809_v56  ;;  %v868_v56 = vld [vmem:[%s1693_s8] sm:$0xff] }
 0x3fd   :  { %v845_v41 = vmax.f32 %v829_v1, 0.0 }
 0x400   :  { %v792_v60 = vpop.f32.mrf.mxu3 }
 0x401   :  { %v810_v62 = vmul.f32 %v792_v60, %v1459_v33  ;;  %v882_v33 = vld [vmem:[%s1693_s8 + $0x70] sm:$0xff]  ;;  %v831_v60 = vmax.f32 %v815_v44, 0.0 }
 0x402   :  { %889 = vmatpush.msrb.mxu1 %v882_v33 }
 0x403   :  { %v830_v0 = vadd.f32 %v1596_v59, %v810_v62  ;;  %v1105_v59 = vld [vmem:[#allocation13] ss:$0 sm:$0xff] }
 0x404   :  { %890 = vmatpush.msrb.mxu1 %v881_v35 }
 0x405   :  { %v846_v3 = vmax.f32 %v830_v0, 0.0 }
 0x406   :  { %891 = vmatpush.msrb.mxu1 %v880_v9 }
 0x407   :  { %848 = vmatpush.msrb.mxu0 %v846_v3 }
 0x408   :  { %892 = vmatpush.msrb.mxu1 %v879_v12 }
 0x409   :  { %849 = vmatpush.msrb.mxu0 %v845_v41 }
 0x40a   :  { %893 = vmatpush.msrb.mxu1 %v878_v15 }
 0x40b   :  { %850 = vmatpush.msrb.mxu0 %v844_v7 }
 0x40c   :  { %894 = vmatpush.msrb.mxu1 %v877_v18 }
 0x40d   :  { %851 = vmatpush.msrb.mxu0 %v843_v10 }
 0x40e   :  { %895 = vmatpush.msrb.mxu1 %v876_v21 }
 0x40f   :  { %852 = vmatpush.msrb.mxu0 %v842_v13 }
 0x410   :  { %896 = vmatpush.msrb.mxu1 %v875_v24 }
 0x411   :  { %853 = vmatpush.msrb.mxu0 %v841_v16 }
 0x412   :  { %897 = vmatpush.msrb.mxu1 %v874_v52 }
 0x413   :  { %854 = vmatpush.msrb.mxu0 %v840_v19 }
 0x414   :  { %898 = vmatpush.msrb.mxu1 %v873_v54 }
 0x415   :  { %855 = vmatpush.msrb.mxu0 %v839_v22 }
 0x416   :  { %899 = vmatpush.msrb.mxu1 %v872_v43 }
 0x417   :  { %856 = vmatpush.msrb.mxu0 %v838_v30 }
 0x418   :  { %900 = vmatpush.msrb.mxu1 %v871_v47 }
 0x419   :  { %857 = vmatpush.msrb.mxu0 %v837_v27 }
 0x41a   :  { %901 = vmatpush.msrb.mxu1 %v870_v57 }
 0x41b   :  { %858 = vmatpush.msrb.mxu0 %v836_v28 }
 0x41c   :  { %902 = vmatpush.msrb.mxu1 %v869_v49 }
 0x41d   :  { %859 = vmatpush.msrb.mxu0 %v835_v29 }
 0x41e   :  { %903 = vmatpush.msrb.mxu1 %v868_v56 }
 0x41f   :  { %860 = vmatpush.msrb.mxu0 %v834_v48 }
 0x421   :  { %861 = vmatpush.msrb.mxu0 %v833_v46 }
 0x423   :  { %862 = vmatpush.msrb.mxu0 %v832_v58 }
 0x425   :  { %863 = vmatpush.msrb.mxu0 %v831_v60 }
 0x426   :  { %864 = vmatmul.f32.vlgmr.msrb.gmra.mxu0 %v847_v61 }
 0x4a3   :  { %v865_v62 = vpop.f32.mrf.mxu0 }
 0x4a4   :  { %904 = vmatmul.f32.vlgmr.msrb.gmra.mxu1 %v865_v62 }
 0x521   :  { %v905_v63 = vpop.f32.mrf.mxu1 }
 0x522   :  { %v906_v0 = vadd.f32 %v1105_v59, %v905_v63 }
 0x524   :  { %908 = vst [vmem:[#allocation14] sm:$0xff] %v906_v0 }
 0x525   :  { %919 = dma.vmem_to_hbm [thread:$0]  %s915_s12, 128, %s917_s15, [#allocation4]  }
 0x526   :  { %1306 = dma.done.wait [#allocation4], 128  }
 0x527   :  { %1307 = vsyncadd [#allocation4], 4294967168 }
 0x528   :  { %924 = vsyncpa [#allocation3], 1 }
 0x529   :  { %925 = vsyncpa [#allocation6], 1 }
 0x52a   :  { %926 = vsyncpa [#allocation9], 1 }
 0x52b   :  { %927 = vsyncpa [#allocation12], 1 }
 0x52c   :  { %928 = vsyncpa [#allocation4], 1 }

</bundles_post_ra>
